<compile_context>
chip_gen: v7x
topology: tpu7x:2x2x1
jax: 0.10.0
libtpu: 0.0.40
codegen_flags: <defaults>
</compile_context>

<pallas_src>
import jax
import jax.numpy as jnp
from jax import lax
from jax.experimental import pallas as pl
from jax.experimental.pallas import tpu as pltpu

OUT_DIM = 13  # model output width


def _round_up(n, m):
    return (n + m - 1) // m * m


def menn_kernel(x_ref, ids_ref, w0_ref, b0_ref, w1_ref, b1_ref,
                wout_ref, emb_ref, out_ref):
    """One batch tile of the MENN forward pass.

    x_ref:    (TB, input_dim)     f32  (cast to bf16 in-kernel)
    ids_ref:  (TB, 2)             int32  [:,0]=subject_id, [:,1]=day_id+ns
    w*_ref:   bf16 weights in (in, out) layout; b*_ref f32 (1, out)
    emb_ref:  (n_tot_pad, 13)     f32  rows [0, ns)  = subject_emb + bout
                                        rows [ns, ns+nd) = day_emb
    out_ref:  (TB, 13)            f32
    """
    # Layer 0: Linear(input_dim -> hidden) + ReLU (bf16 MXU, f32 accumulate).
    x = x_ref[...].astype(jnp.bfloat16)
    h = jnp.dot(x, w0_ref[...], preferred_element_type=jnp.float32)
    h = jnp.maximum(h + b0_ref[...], 0.0)
    # TODO(synk): Dropout = identity (eval mode).

    # Layer 1: Linear(hidden -> hidden) + ReLU.
    h = jnp.dot(h.astype(jnp.bfloat16), w1_ref[...],
                preferred_element_type=jnp.float32)
    h = jnp.maximum(h + b1_ref[...], 0.0)

    # Output head: Linear(hidden -> 13).  bout is folded into the embedding
    # table (subject rows), so no separate bias add here.
    fixed = jnp.dot(h.astype(jnp.bfloat16), wout_ref[...],
                    preferred_element_type=jnp.float32)

    # Mixed effects: single merged one-hot gather against the tiny resident
    # table.  Each row hits exactly one subject column and one (offset) day
    # column, so one matmul yields bout + subject_effect + day_effect.
    tb = x_ref.shape[0]
    n_tot = emb_ref.shape[0]
    iota = lax.broadcasted_iota(jnp.int32, (tb, n_tot), 1)
    one_hot = jnp.logical_or(iota == ids_ref[:, 0:1],
                             iota == ids_ref[:, 1:2]).astype(jnp.float32)
    rand = jnp.dot(one_hot, emb_ref[...], preferred_element_type=jnp.float32)

    out_ref[...] = fixed + rand


def menn_forward(x, params, subject_ids, day_ids, *, tb=1024):
    """x: (B, input_dim) f32; subject_ids/day_ids: (B,) int."""
    B, input_dim = x.shape
    hidden = params["w0"].shape[1]
    ns = params["subject_emb"].shape[0]
    nd = params["day_emb"].shape[0]

    # --- tile / grid selection ----------------------------------------------
    # Minimal padding (<8 rows per tile); >=2 grid steps once the batch is big
    # enough that splitting it across v7x's two TensorCores is worthwhile.
    n_tiles = max(pl.cdiv(B, tb), 1)
    if B >= 256:
        n_tiles = max(n_tiles, 2)
    TB = _round_up(pl.cdiv(B, n_tiles), 8)
    B_pad = n_tiles * TB
    grid = (n_tiles,)

    # --- blocked (per-tile) inputs ------------------------------------------
    # x stays f32 (cast in-kernel); ids packed as (sid, did + ns).
    ids = jnp.stack([subject_ids.astype(jnp.int32),
                     day_ids.astype(jnp.int32) + ns], axis=1)
    if B_pad != B:
        pad_rows = B_pad - B
        x_in = jnp.pad(x, ((0, pad_rows), (0, 0)))
        ids_in = jnp.pad(ids, ((0, pad_rows), (0, 0)))
    else:
        x_in, ids_in = x, ids

    # --- VMEM-resident weights (constant index_maps) -------------------------
    w0 = params["w0"].astype(jnp.bfloat16)
    b0 = params["b0"].astype(jnp.float32)
    w1 = params["w1"].astype(jnp.bfloat16)
    b1 = params["b1"].astype(jnp.float32)
    wout = params["wout"].astype(jnp.bfloat16)

    # Merged embedding table; bout folded into subject rows (each row selects
    # exactly one subject, so bout is picked up exactly once).
    emb = jnp.concatenate(
        [params["subject_emb"].astype(jnp.float32)
         + params["bout"].astype(jnp.float32),
         params["day_emb"].astype(jnp.float32)], axis=0)
    n_tot = ns + nd
    n_tot_pad = _round_up(n_tot, 8)
    if n_tot_pad != n_tot:
        emb = jnp.pad(emb, ((0, n_tot_pad - n_tot), (0, 0)))

    def tiled(shape):
        return pl.BlockSpec(shape, lambda i: (i, 0))

    def const(shape):
        return pl.BlockSpec(shape, lambda i: (0, 0))

    in_specs = [
        tiled((TB, input_dim)),       # x (f32)
        tiled((TB, 2)),               # packed ids (int32)
        const((input_dim, hidden)),   # w0
        const((1, hidden)),           # b0
        const((hidden, hidden)),      # w1
        const((1, hidden)),           # b1
        const((hidden, OUT_DIM)),     # wout
        const((n_tot_pad, OUT_DIM)),  # merged embedding table (+ bout)
    ]

    out = pl.pallas_call(
        menn_kernel,
        out_shape=jax.ShapeDtypeStruct((B_pad, OUT_DIM), jnp.float32),
        grid=grid,
        in_specs=in_specs,
        out_specs=tiled((TB, OUT_DIM)),
        compiler_params=pltpu.CompilerParams(
            dimension_semantics=("parallel",)),
    )(x_in, ids_in, w0, b0, w1, b1, wout, emb)

    return out if B_pad == B else out[:B]


def init_params(key, num_layers, input_dim, hidden_dim, num_subjects, num_days):
    assert num_layers == 2, "script specializes the kernel to num_layers=2"
    ks = jax.random.split(key, 8)
    return {
        # Linear weights stored as (in, out) so kernel does x @ W + b.
        "w0": jax.random.normal(ks[0], (input_dim, hidden_dim), jnp.float32) * 0.1,
        "b0": jax.random.normal(ks[1], (1, hidden_dim), jnp.float32) * 0.1,
        "w1": jax.random.normal(ks[2], (hidden_dim, hidden_dim), jnp.float32) * 0.1,
        "b1": jax.random.normal(ks[3], (1, hidden_dim), jnp.float32) * 0.1,
        "wout": jax.random.normal(ks[4], (hidden_dim, 13), jnp.float32) * 0.1,
        "bout": jax.random.normal(ks[5], (1, 13), jnp.float32) * 0.1,
        "subject_emb": jax.random.normal(ks[6], (num_subjects, 13), jnp.float32) * 0.1,
        "day_emb": jax.random.normal(ks[7], (num_days, 13), jnp.float32) * 0.1,
    }


def reference_forward(x, params, subject_ids, day_ids):
    h = jnp.maximum(x @ params["w0"] + params["b0"], 0.0)
    h = jnp.maximum(h @ params["w1"] + params["b1"], 0.0)
    fixed = h @ params["wout"] + params["bout"]
    return fixed + params["subject_emb"][subject_ids] + params["day_emb"][day_ids]


if __name__ == "__main__":
    num_layers = 2
    input_dim = 32
    hidden_dim = 32
    num_subjects = 4
    num_days = 3

    key = jax.random.PRNGKey(0)
    k_params, k_x, k_subj, k_day = jax.random.split(key, 4)
    params = init_params(k_params, num_layers, input_dim, hidden_dim,
                         num_subjects, num_days)

    # Small case (matches the module's typical usage; single grid step).
    B = 8
    x = jax.random.normal(k_x, (B, input_dim), jnp.float32)
    subject_ids = jax.random.randint(k_subj, (B,), 0, num_subjects, jnp.int32)
    day_ids = jax.random.randint(k_day, (B,), 0, num_days, jnp.int32)

    out = menn_forward(x, params, subject_ids, day_ids)
    out = jax.block_until_ready(out)
    ref = reference_forward(x, params, subject_ids, day_ids)
    assert out.shape == (B, 13)
    assert jnp.allclose(out, ref, atol=3e-2, rtol=3e-2), (
        f"max abs err {float(jnp.max(jnp.abs(out - ref)))}")

    # Larger ragged batch: exercises the multi-step (dual-TC capable) grid and
    # the minimal-padding path (B=300 -> 2 tiles of 152 rows, 4 padded rows).
    B2 = 300
    k_x2, k_s2, k_d2 = jax.random.split(jax.random.PRNGKey(1), 3)
    x2 = jax.random.normal(k_x2, (B2, input_dim), jnp.float32)
    sid2 = jax.random.randint(k_s2, (B2,), 0, num_subjects, jnp.int32)
    did2 = jax.random.randint(k_d2, (B2,), 0, num_days, jnp.int32)

    out2 = jax.block_until_ready(menn_forward(x2, params, sid2, did2))
    ref2 = reference_forward(x2, params, sid2, did2)
    assert out2.shape == (B2, 13)
    assert jnp.allclose(out2, ref2, atol=3e-2, rtol=3e-2), (
        f"max abs err {float(jnp.max(jnp.abs(out2 - ref2)))}")

    print("KERNEL_OK")
</pallas_src>

<mosaic_0001>
module attributes {stable_mosaic.version = 11 : i64} {
  func.func @menn_kernel(%arg0: i32, %arg1: memref<8x32xf32, #tpu.memory_space<vmem>>, %arg2: memref<8x2xi32, #tpu.memory_space<vmem>>, %arg3: memref<32x32xbf16, #tpu.memory_space<vmem>>, %arg4: memref<1x32xf32, #tpu.memory_space<vmem>>, %arg5: memref<32x32xbf16, #tpu.memory_space<vmem>>, %arg6: memref<1x32xf32, #tpu.memory_space<vmem>>, %arg7: memref<32x13xbf16, #tpu.memory_space<vmem>>, %arg8: memref<8x13xf32, #tpu.memory_space<vmem>>, %arg9: memref<8x13xf32, #tpu.memory_space<vmem>>) attributes {dimension_semantics = [#tpu.dimension_semantics<parallel>], iteration_bounds = array<i64: 1>, scalar_prefetch = 0 : i64, scratch_operands = 0 : i64, tpu.core_type = #tpu.core_type<tc>, window_params = [{transform_indices = @transform_0, window_bounds = array<i64: 8, 32>}, {transform_indices = @transform_1, window_bounds = array<i64: 8, 2>}, {pipeline_mode = #tpu.pipeline_mode<synchronous>, transform_indices = @transform_2, window_bounds = array<i64: 32, 32>}, {pipeline_mode = #tpu.pipeline_mode<synchronous>, transform_indices = @transform_3, window_bounds = array<i64: 1, 32>}, {pipeline_mode = #tpu.pipeline_mode<synchronous>, transform_indices = @transform_4, window_bounds = array<i64: 32, 32>}, {pipeline_mode = #tpu.pipeline_mode<synchronous>, transform_indices = @transform_5, window_bounds = array<i64: 1, 32>}, {pipeline_mode = #tpu.pipeline_mode<synchronous>, transform_indices = @transform_6, window_bounds = array<i64: 32, 13>}, {pipeline_mode = #tpu.pipeline_mode<synchronous>, transform_indices = @transform_7, window_bounds = array<i64: 8, 13>}, {transform_indices = @transform_8, window_bounds = array<i64: 8, 13>}]} {
    %c0 = arith.constant 0 : index
    %c0_0 = arith.constant 0 : index
    %0 = vector.load %arg1[%c0, %c0_0] : memref<8x32xf32, #tpu.memory_space<vmem>>, vector<8x32xf32>
    %1 = arith.truncf %0 : vector<8x32xf32> to vector<8x32xbf16>
    %c0_1 = arith.constant 0 : index
    %c0_2 = arith.constant 0 : index
    %2 = vector.load %arg3[%c0_1, %c0_2] : memref<32x32xbf16, #tpu.memory_space<vmem>>, vector<32x32xbf16>
    %cst = arith.constant dense<0.000000e+00> : vector<8x32xf32>
    %3 = tpu.matmul %1, %2, %cst {dimension_numbers = #tpu.dot_dimension_numbers<[1], [0], [0], [1], [0, 0, 1, 1], [], []>} : vector<8x32xbf16>, vector<32x32xbf16>, vector<8x32xf32> -> vector<8x32xf32>
    %c0_3 = arith.constant 0 : index
    %c0_4 = arith.constant 0 : index
    %4 = vector.load %arg4[%c0_3, %c0_4] : memref<1x32xf32, #tpu.memory_space<vmem>>, vector<1x32xf32>
    %5 = vector.broadcast %4 : vector<1x32xf32> to vector<8x32xf32>
    %6 = arith.addf %3, %5 : vector<8x32xf32>
    %cst_5 = arith.constant 0.000000e+00 : f32
    %7 = vector.broadcast %cst_5 : f32 to vector<8x32xf32>
    %8 = arith.maximumf %6, %7 : vector<8x32xf32>
    %9 = arith.truncf %8 : vector<8x32xf32> to vector<8x32xbf16>
    %c0_6 = arith.constant 0 : index
    %c0_7 = arith.constant 0 : index
    %10 = vector.load %arg5[%c0_6, %c0_7] : memref<32x32xbf16, #tpu.memory_space<vmem>>, vector<32x32xbf16>
    %cst_8 = arith.constant dense<0.000000e+00> : vector<8x32xf32>
    %11 = tpu.matmul %9, %10, %cst_8 {dimension_numbers = #tpu.dot_dimension_numbers<[1], [0], [0], [1], [0, 0, 1, 1], [], []>} : vector<8x32xbf16>, vector<32x32xbf16>, vector<8x32xf32> -> vector<8x32xf32>
    %c0_9 = arith.constant 0 : index
    %c0_10 = arith.constant 0 : index
    %12 = vector.load %arg6[%c0_9, %c0_10] : memref<1x32xf32, #tpu.memory_space<vmem>>, vector<1x32xf32>
    %13 = vector.broadcast %12 : vector<1x32xf32> to vector<8x32xf32>
    %14 = arith.addf %11, %13 : vector<8x32xf32>
    %cst_11 = arith.constant 0.000000e+00 : f32
    %15 = vector.broadcast %cst_11 : f32 to vector<8x32xf32>
    %16 = arith.maximumf %14, %15 : vector<8x32xf32>
    %17 = arith.truncf %16 : vector<8x32xf32> to vector<8x32xbf16>
    %c0_12 = arith.constant 0 : index
    %c0_13 = arith.constant 0 : index
    %18 = vector.load %arg7[%c0_12, %c0_13] : memref<32x13xbf16, #tpu.memory_space<vmem>>, vector<32x13xbf16>
    %cst_14 = arith.constant dense<0.000000e+00> : vector<8x13xf32>
    %19 = tpu.matmul %17, %18, %cst_14 {dimension_numbers = #tpu.dot_dimension_numbers<[1], [0], [0], [1], [0, 0, 1, 1], [], []>} : vector<8x32xbf16>, vector<32x13xbf16>, vector<8x13xf32> -> vector<8x13xf32>
    %20 = tpu.iota {dimensions = array<i32: 1>} : vector<8x8xi32>
    %c0_15 = arith.constant 0 : index
    %c0_16 = arith.constant 0 : index
    %21 = vector.load %arg2[%c0_15, %c0_16] : memref<8x2xi32, #tpu.memory_space<vmem>>, vector<8x1xi32>
    %22 = vector.broadcast %21 : vector<8x1xi32> to vector<8x8xi32>
    %23 = arith.cmpi eq, %20, %22 : vector<8x8xi32>
    %c0_17 = arith.constant 0 : index
    %c1 = arith.constant 1 : index
    %24 = vector.load %arg2[%c0_17, %c1] : memref<8x2xi32, #tpu.memory_space<vmem>>, vector<8x1xi32>
    %25 = vector.broadcast %24 : vector<8x1xi32> to vector<8x8xi32>
    %26 = arith.cmpi eq, %20, %25 : vector<8x8xi32>
    %27 = arith.ori %23, %26 : vector<8x8xi1>
    %28 = arith.extui %27 : vector<8x8xi1> to vector<8x8xi32>
    %29 = arith.sitofp %28 : vector<8x8xi32> to vector<8x8xf32>
    %c0_18 = arith.constant 0 : index
    %c0_19 = arith.constant 0 : index
    %30 = vector.load %arg8[%c0_18, %c0_19] : memref<8x13xf32, #tpu.memory_space<vmem>>, vector<8x13xf32>
    %cst_20 = arith.constant dense<0.000000e+00> : vector<8x13xf32>
    %31 = tpu.matmul %29, %30, %cst_20 {dimension_numbers = #tpu.dot_dimension_numbers<[1], [0], [0], [1], [0, 0, 1, 1], [], []>} : vector<8x8xf32>, vector<8x13xf32>, vector<8x13xf32> -> vector<8x13xf32>
    %32 = arith.addf %19, %31 : vector<8x13xf32>
    %c0_21 = arith.constant 0 : index
    %c0_22 = arith.constant 0 : index
    %33 = vector.load %arg9[%c0_21, %c0_22] : memref<8x13xf32, #tpu.memory_space<vmem>>, vector<8x13xf32>
    tpu.vector_store %arg9[%c0_21, %c0_22], %32 {strides = array<i32>} : memref<8x13xf32, #tpu.memory_space<vmem>>, vector<8x13xf32>,
    return
  }
  func.func @transform_0(%arg0: i32) -> (i32, i32) {
    %c0_i32 = arith.constant 0 : i32
    %c0_i32_0 = arith.constant 0 : i32
    return %arg0, %c0_i32 : i32, i32
  }
  func.func @transform_1(%arg0: i32) -> (i32, i32) {
    %c0_i32 = arith.constant 0 : i32
    %c0_i32_0 = arith.constant 0 : i32
    return %arg0, %c0_i32 : i32, i32
  }
  func.func @transform_2(%arg0: i32) -> (i32, i32) {
    %c0_i32 = arith.constant 0 : i32
    %c0_i32_0 = arith.constant 0 : i32
    %c0_i32_1 = arith.constant 0 : i32
    return %c0_i32, %c0_i32_0 : i32, i32
  }
  func.func @transform_3(%arg0: i32) -> (i32, i32) {
    %c0_i32 = arith.constant 0 : i32
    %c0_i32_0 = arith.constant 0 : i32
    %c0_i32_1 = arith.constant 0 : i32
    return %c0_i32, %c0_i32_0 : i32, i32
  }
  func.func @transform_4(%arg0: i32) -> (i32, i32) {
    %c0_i32 = arith.constant 0 : i32
    %c0_i32_0 = arith.constant 0 : i32
    %c0_i32_1 = arith.constant 0 : i32
    return %c0_i32, %c0_i32_0 : i32, i32
  }
  func.func @transform_5(%arg0: i32) -> (i32, i32) {
    %c0_i32 = arith.constant 0 : i32
    %c0_i32_0 = arith.constant 0 : i32
    %c0_i32_1 = arith.constant 0 : i32
    return %c0_i32, %c0_i32_0 : i32, i32
  }
  func.func @transform_6(%arg0: i32) -> (i32, i32) {
    %c0_i32 = arith.constant 0 : i32
    %c0_i32_0 = arith.constant 0 : i32
    %c0_i32_1 = arith.constant 0 : i32
    return %c0_i32, %c0_i32_0 : i32, i32
  }
  func.func @transform_7(%arg0: i32) -> (i32, i32) {
    %c0_i32 = arith.constant 0 : i32
    %c0_i32_0 = arith.constant 0 : i32
    %c0_i32_1 = arith.constant 0 : i32
    return %c0_i32, %c0_i32_0 : i32, i32
  }
  func.func @transform_8(%arg0: i32) -> (i32, i32) {
    %c0_i32 = arith.constant 0 : i32
    %c0_i32_0 = arith.constant 0 : i32
    return %arg0, %c0_i32 : i32, i32
  }
}

</mosaic_0001>

<bundles_post_ra>
// kernel: tpu_custom_call.1
= control target key start
LH: loop header
LB: loop body
LE: loop exit
PB: predicated region body
PF: predicated region fallthrough
CT: control target
= control target key end

     0   :  { %13 = vsyncpa [#allocation3], 0  ;;  %s574_s0 = inlined_call_operand.hbm [shape: f32[8,32], index: 0, kind: input, shape index: {}]   ;;  %s575_s1 = inlined_call_operand.vmem [shape: s32[8,2], index: 1, kind: input, shape index: {}]   ;;  %s576_s2 = inlined_call_operand.vmem [shape: bf16[32,32], index: 2, kind: input, shape index: {}]   ;;  %s577_s3 = inlined_call_operand.vmem [shape: f32[1,32], index: 3, kind: input, shape index: {}]   ;;  %s578_s4 = inlined_call_operand.vmem [shape: bf16[32,32], index: 4, kind: input, shape index: {}]   ;;  %s579_s5 = inlined_call_operand.vmem [shape: f32[1,32], index: 5, kind: input, shape index: {}]   ;;  %s580_s6 = inlined_call_operand.vmem [shape: bf16[32,13], index: 6, kind: input, shape index: {}]   ;;  %s581_s7 = inlined_call_operand.vmem [shape: f32[8,13], index: 7, kind: input, shape index: {}]   ;;  %s582_s8 = inlined_call_operand.hbm [shape: f32[8,13], index: 8, kind: output, shape index: {}]  }
   0x1   :  { %14 = vsyncpa [#allocation4], 0  ;;  %s462_s27 = smov [#allocation2]   ;;  %s414_s9 = scalar_lea.hbm %s574_s0, 128 }
   0x2   :  { %s21_s28 = sshll.u32 %s462_s27, 4  ;;  %p415_p0 = scmp.ne.s32.totalorder %s574_s0, %s414_s9  ;;  %s22_s28 = int_to_ptr.vmem [resolvable:$true] %s21_s28 }
   0x3   :  { %p418_p1 = scmp.lt.u32.totalorder %s414_s9, %s574_s0 }
   0x5   :  { %p420_p2 = pnand %p418_p1, %p415_p0 }
   0x7   :  { %423 = shalt.err (!%p420_p2)
}
   0x8   :  { %s424_s14 = scalar_lea.vmem %s22_s28, 128  ;;  %p429_p4 = scmp.lt.s32.totalorder %s22_s28, %s22_s28 }
   0x9   :  { %p425_p3 = scmp.ne.s32.totalorder %s22_s28, %s424_s14  ;;  %p430_p5 = scmp.lt.s32.totalorder %s424_s14, %s424_s14 }
   0xb   :  { %p431_p6 = por %p430_p5, %p429_p4 }
   0xd   :  { %p432_p7 = pnand %p431_p6, %p425_p3 }
   0xf   :  { %435 = shalt.err (!%p432_p7)
}
  0x10   :  { %24 = dma.hbm_to_vmem [thread:$0]  %s574_s0, 128, %s22_s28, [#allocation3]  }
  0x11   :  { %458 = dma.done.wait [#allocation3], 128  }
  0x12   :  { %459 = vsyncadd [#allocation3], 4294967168  ;;  %v463_v0 = vmov 0.0   ;;  %vm464_vm0 = vmmov 0   ;;  %v408_v1 = vld [vmem:[%s576_s2] sm:$0xff]   ;;  %v409_v2 = vld [vmem:[%s576_s2 + $0x8] sm:$0xff]   ;;  %v186_v21 = vlaneseq }
  0x13   :  { %371 = vmatprep.subr.bf16.mxu0 %v463_v0  ;;  %375 = vmatprep.mubr.msk.bf16.mxu0 %vm464_vm0, %v463_v0  ;;  %v43_v3 = vld [vmem:[#allocation2] sm:$0xff]  ;;  %vm68_vm1 = vcmask 261120   ;;  %v411_v6 = vld [vmem:[%s578_s4 + $0x8] sm:$0xff]   ;;  %v465_v8 = vmov 0   ;;  %v466_v9 = vmov 1   ;;  %vm201_vm5 = vcmask 64512  }
  0x14   :  { %379 = vmatprep.subr.bf16.mxu1 %v463_v0  ;;  %383 = vmatprep.mubr.msk.bf16.mxu1 %vm464_vm0, %v463_v0  ;;  %v44_v4 = vpack.c.bf16 %v43_v3, %v43_v3  ;;  %v410_v5 = vld [vmem:[%s578_s4] sm:$0xff]   ;;  %v187_v22 = vand.u32 127, %v186_v21  ;;  %v413_v25 = vld [vmem:[%s580_s6 + $0x8] sm:$0xff]   ;;  %s467_s9 = smov [#allocation5]   ;;  %vm330_vm6 = vcmask 105472  }
  0x15   :  { %372 = vmatpush3.bf16.msra.mxu0 %v408_v1  ;;  %380 = vmatpush3.bf16.msra.mxu1 %v410_v5  ;;  %v188_v7 = vld [vmem:[%s575_s1] sm:$0xff]  ;;  %s338_s10 = sshll.u32 %s467_s9, 4  ;;  %s339_s10 = int_to_ptr.vmem [resolvable:$true] %s338_s10 }
  0x16   :  { %373 = vmatprep.subr.bf16.mxu0 %v463_v0  ;;  %381 = vmatprep.subr.bf16.mxu1 %v463_v0  ;;  %v200_v10 = vld [vmem:[%s581_s7] sm:$0xff]  ;;  %p441_p9 = scmp.lt.s32.totalorder %s339_s10, %s339_s10 }
  0x17   :  { %406 = vset.pattern.permute.xlu0 %v465_v8  ;;  %v347_v11 = vld [vmem:[%s577_s3] ss:$0 sm:$0xff] }
  0x18   :  { %190 = vperm.xlu0 %406, %v188_v7   ;;  %v412_v18 = vld [vmem:[%s580_s6] sm:$0xff]  }
  0x19   :  { %374 = vmatpush3.bf16.msra.mxu0 %v409_v2  ;;  %382 = vmatpush3.bf16.msra.mxu1 %v411_v6  ;;  %v351_v26 = vld [vmem:[%s579_s5] ss:$0 sm:$0xff]  ;;  %s436_s5 = scalar_lea.vmem %s339_s10, 128 }
  0x1a   :  { %387 = vmatprep.subr.mxu0 %v463_v0  ;;  %392 = vmatprep.subr.bf16.mxu1 %v463_v0  ;;  %p437_p8 = scmp.ne.s32.totalorder %s339_s10, %s436_s5  ;;  %p442_p10 = scmp.lt.s32.totalorder %s436_s5, %s436_s5 }
  0x1c   :  { %376 = vmatmul.mubr.msk.bf16.vlgmr.msra.gmra.mrb[0].mxu0 %vm68_vm1, %v44_v4  ;;  %407 = vset.pattern.permute.xlu0 %v466_v9  ;;  %p443_p11 = por %p442_p10, %p441_p9 }
  0x1d   :  { %389 = vmatprep.mubr.msk.f32.mxu0 %vm464_vm0, %v463_v0  ;;  %194 = vperm.xlu0 %407, %v188_v7  }
  0x1e   :  { %388 = vmatpush3.msra.mxu0 %v200_v10  ;;  %p444_p12 = pnand %p443_p11, %p437_p8 }
  0x97   :  { %v191_v20 = vpop.permute.xlu0 %190 }
  0x98   :  { %vm192_vm2 = vcmp.eq.s32.totalorder %v187_v22, %v191_v20 }
  0x9c   :  { %v195_v23 = vpop.permute.xlu0 %194 }
  0x9d   :  { %vm196_vm3 = vcmp.eq.s32.totalorder %v187_v22, %v195_v23 }
  0x9e   :  { %vm197_vm4 = vmor %vm192_vm2, %vm196_vm3 }
  0x9f   :  { %v355_v24 = vsel %vm197_vm4, 1.0, %v463_v0 }
  0xa0   :  { %390 = vmatmul.mubr.msk.f32.vlgmr.msra.gmra.mrb[4].mxu0 %vm201_vm5, %v355_v24 }
  0xef   :  { %v106_v12 = vpop.f32.mrb[0].mxu0 }
  0xf0   :  { %v107_v13 = vadd.f32 %v347_v11, %v106_v12  ;;  %v377_v14 = vpop.f32.mrb[1].mxu0 }
  0xf1   :  { %v109_v15 = vpop.f32.mrb[2].mxu0 }
  0xf2   :  { %v112_v16 = vmax.f32 %v107_v13, 0.0  ;;  %v378_v17 = vpop.f32.mrb[3].mxu0 }
  0xf4   :  { %v113_v19 = vpack.c.bf16 %v112_v16, %v112_v16 }
  0xf6   :  { %384 = vmatmul.mubr.msk.bf16.vlgmr.msra.gmra.mrb[0].mxu1 %vm68_vm1, %v113_v19 }
  0xf7   :  { %393 = vmatpush3.bf16.msra.mxu1 %v412_v18  ;;  %396 = vmatprep.mubr.msk.bf16.mxu1 %vm464_vm0, %v463_v0 }
  0xf8   :  { %394 = vmatprep.subr.bf16.mxu1 %v463_v0 }
  0xfb   :  { %395 = vmatpush3.bf16.msra.mxu1 %v413_v25 }
 0x173   :  { %v271_v34 = vpop.f32.mrb[4].mxu0 }
 0x174   :  { %v391_v35 = vpop.f32.mrb[5].mxu0 }
 0x1c9   :  { %v174_v27 = vpop.f32.mrb[0].mxu1 }
 0x1ca   :  { %v175_v28 = vadd.f32 %v351_v26, %v174_v27  ;;  %v385_v29 = vpop.f32.mrb[1].mxu1 }
 0x1cb   :  { %v177_v30 = vpop.f32.mrb[2].mxu1 }
 0x1cc   :  { %v180_v31 = vmax.f32 %v175_v28, 0.0  ;;  %v386_v32 = vpop.f32.mrb[3].mxu1 }
 0x1ce   :  { %v181_v33 = vpack.c.bf16 %v180_v31, %v180_v31 }
 0x1d0   :  { %397 = vmatmul.mubr.msk.bf16.vlgmr.msra.gmra.mrb[4].mxu1 %vm68_vm1, %v181_v33 }
 0x2a3   :  { %v324_v36 = vpop.f32.mrb[4].mxu1 }
 0x2a4   :  { %v325_v37 = vadd.f32 %v324_v36, %v271_v34  ;;  %v398_v38 = vpop.f32.mrb[5].mxu1 }
 0x2a5   :  { %v327_v39 = vpop.f32.mrb[6].mxu1 }
 0x2a6   :  { %v399_v40 = vpop.f32.mrb[7].mxu1  ;;  %331 = vst.msk [vmem:[#allocation5] sm:$0xff] %vm330_vm6, %v325_v37 }
 0x2a7   :  { %447 = shalt.err (!%p444_p12)
}
 0x2a8   :  { %s448_s12 = scalar_lea.hbm %s582_s8, 128 }
 0x2a9   :  { %p449_p13 = scmp.ne.s32.totalorder %s582_s8, %s448_s12  ;;  %p452_p0 = scmp.lt.u32.totalorder %s448_s12, %s582_s8 }
 0x2ab   :  { %p454_p1 = pnand %p452_p0, %p449_p13 }
 0x2ad   :  { %457 = shalt.err (!%p454_p1)
}
 0x2ae   :  { %341 = dma.vmem_to_hbm [thread:$0]  %s339_s10, 128, %s582_s8, [#allocation4]  }
 0x2af   :  { %460 = dma.done.wait [#allocation4], 128  }
 0x2b0   :  { %461 = vsyncadd [#allocation4], 4294967168 }
 0x2b1   :  { %345 = vsyncpa [#allocation3], 1 }
 0x2b2   :  { %346 = vsyncpa [#allocation4], 1 }

</bundles_post_ra>
